<compile_context>
chip_gen: v5e
topology: v5e:2x2
jax: 0.10.0
libtpu: 0.0.40
codegen_flags: <defaults>
</compile_context>

<pallas_src>
import functools

import jax
import jax.numpy as jnp
from jax.experimental import pallas as pl
from jax.experimental.pallas import tpu as pltpu

N_NEURONS = 50     # logical hidden width (matches the PyTorch module)
HIDDEN_PAD = 128   # lane-aligned padded hidden width
SUBLANE = 8


def _round_up(x, m):
    return (x + m - 1) // m * m


def _cdiv(a, b):
    return -(-a // b)


def _choose_batch_tile(B, block_b):
    """Pick a batch tile that (nearly) divides B and gives >=2 grid steps
    when the batch is large enough (v7x megacore)."""
    n_tiles = max(1, _cdiv(B, max(block_b, SUBLANE)))
    if B >= 2 * SUBLANE and n_tiles < 2:
        n_tiles = 2  # let dimension_semantics=("parallel",) shard across 2 TCs
    bb = _round_up(_cdiv(B, n_tiles), SUBLANE)
    b_pad = _round_up(B, bb)
    return bb, b_pad


def _generator_kernel(x_ref, w1_ref, b1_ref, w2_ref, b2_ref, w3_ref, b3_ref,
                      o_ref):
    # One batch tile per grid step. Weights/biases are whole-array VMEM
    # residents. Matmul operands may be bf16 (pre-cast in the wrapper);
    # accumulation, bias add and tanh run in f32.
    x = x_ref[...]
    h1 = jnp.tanh(
        jnp.dot(x, w1_ref[...], preferred_element_type=jnp.float32) + b1_ref[...]
    ).astype(w2_ref.dtype)
    h2 = jnp.tanh(
        jnp.dot(h1, w2_ref[...], preferred_element_type=jnp.float32) + b2_ref[...]
    ).astype(w3_ref.dtype)
    out = jnp.dot(h2, w3_ref[...], preferred_element_type=jnp.float32) + b3_ref[...]
    o_ref[...] = out.astype(o_ref.dtype)


def generator_forward(x, params, *, block_b=2048, matmul_dtype=jnp.float32,
                      out_dtype=jnp.float32):
    """Generator forward pass as a batch-tiled Pallas TPU kernel.

    x:      [B, g_input_dim] float32
    params: dict with w1 [in,50], b1 [1,50], w2 [50,50], b2 [1,50],
            w3 [50,out], b3 [1,out]   (logical, unpadded PyTorch shapes)
    returns: [B, g_output_dim] in `out_dtype`
    """
    B, d_in = x.shape
    d_out = params["w3"].shape[1]
    h_pad = HIDDEN_PAD

    # --- zero-pad weights to aligned hidden width (numerically identical) ---
    def pad2(a, rows, cols):
        return jnp.pad(a, ((0, rows - a.shape[0]), (0, cols - a.shape[1])))

    w1 = pad2(params["w1"], d_in, h_pad).astype(matmul_dtype)
    b1 = pad2(params["b1"], 1, h_pad)                      # f32 bias add
    w2 = pad2(params["w2"], h_pad, h_pad).astype(matmul_dtype)
    b2 = pad2(params["b2"], 1, h_pad)
    w3 = pad2(params["w3"], h_pad, d_out).astype(matmul_dtype)
    b3 = params["b3"]                                      # (1, d_out), f32

    # --- batch tiling: near-divisor tile, >=2 steps when batch allows ---
    bb, b_pad = _choose_batch_tile(B, block_b)
    x_p = x.astype(matmul_dtype)
    if b_pad != B:
        x_p = jnp.pad(x_p, ((0, b_pad - B), (0, 0)))
    grid = (b_pad // bb,)

    # --- advisory cost estimate for XLA scheduling ---
    flops = 2 * b_pad * (d_in * h_pad + h_pad * h_pad + h_pad * d_out)
    transcendentals = 2 * b_pad * h_pad
    bytes_per = jnp.dtype(matmul_dtype).itemsize
    weight_bytes = int(bytes_per * (w1.size + w2.size + w3.size)
                       + 4 * (b1.size + b2.size + b3.size))
    bytes_accessed = (bytes_per * b_pad * d_in
                      + jnp.dtype(out_dtype).itemsize * b_pad * d_out
                      + weight_bytes)

    vmem_spec = pl.BlockSpec(memory_space=pltpu.MemorySpace.VMEM)

    out = pl.pallas_call(
        _generator_kernel,
        out_shape=jax.ShapeDtypeStruct((b_pad, d_out), out_dtype),
        grid=grid,
        in_specs=[
            # streamed per batch tile (d_in = full last dim -> legal block)
            pl.BlockSpec((bb, d_in), lambda i: (i, 0)),
            # weights / biases: whole-array, resident in VMEM (single DMA)
            vmem_spec,  # w1
            vmem_spec,  # b1
            vmem_spec,  # w2
            vmem_spec,  # b2
            vmem_spec,  # w3
            vmem_spec,  # b3
        ],
        # d_out = full last dim -> legal block, no write amplification
        out_specs=pl.BlockSpec((bb, d_out), lambda i: (i, 0)),
        compiler_params=pltpu.CompilerParams(
            dimension_semantics=("parallel",),
        ),
        cost_estimate=pl.CostEstimate(
            flops=flops,
            transcendentals=transcendentals,
            bytes_accessed=bytes_accessed,
        ),
    )(x_p, w1, b1, w2, b2, w3, b3)

    # strip batch padding only (no column padding anymore)
    return out if b_pad == B else out[:B]


def init_generator_params(key, g_input_dim, g_output_dim):
    """Deterministic init mimicking nn.Linear's U(-1/sqrt(fan_in), 1/sqrt(fan_in))."""
    ks = jax.random.split(key, 6)

    def lin(kw, kb, fan_in, fan_out):
        bound = 1.0 / jnp.sqrt(jnp.float32(fan_in))
        w = jax.random.uniform(kw, (fan_in, fan_out), jnp.float32, -bound, bound)
        b = jax.random.uniform(kb, (1, fan_out), jnp.float32, -bound, bound)
        return w, b

    w1, b1 = lin(ks[0], ks[1], g_input_dim, N_NEURONS)
    w2, b2 = lin(ks[2], ks[3], N_NEURONS, N_NEURONS)
    w3, b3 = lin(ks[4], ks[5], N_NEURONS, g_output_dim)
    return {"w1": w1, "b1": b1, "w2": w2, "b2": b2, "w3": w3, "b3": b3}


def generator_ref(x, p):
    h1 = jnp.tanh(x @ p["w1"] + p["b1"])
    h2 = jnp.tanh(h1 @ p["w2"] + p["b2"])
    return h2 @ p["w3"] + p["b3"]


if __name__ == "__main__":
    key = jax.random.PRNGKey(0)
    k_params, k_x, k_x2 = jax.random.split(key, 3)

    g_input_dim = 16   # latent dim fed to the generator
    g_output_dim = 32  # generated sample dim
    params = init_generator_params(k_params, g_input_dim, g_output_dim)

    # --- small batch: single grid step ---
    B = 8
    x = jax.random.normal(k_x, (B, g_input_dim), jnp.float32)
    ref = generator_ref(x, params)
    out = jax.block_until_ready(generator_forward(x, params))
    assert out.shape == (B, g_output_dim)
    assert jnp.allclose(out, ref, atol=1e-4, rtol=1e-4)

    # --- non-aligned batch: exercises tile selection, padding & multi-step grid ---
    B2 = 200
    x2 = jax.random.normal(k_x2, (B2, g_input_dim), jnp.float32)
    ref2 = generator_ref(x2, params)
    out2 = jax.block_until_ready(generator_forward(x2, params, block_b=64))
    assert out2.shape == (B2, g_output_dim)
    assert jnp.allclose(out2, ref2, atol=1e-4, rtol=1e-4)

    # --- bf16-operand fast path (v6e/v7x MXU); f32 accumulation, looser tol ---
    out_bf16 = jax.block_until_ready(
        generator_forward(x, params, matmul_dtype=jnp.bfloat16)
    )
    assert out_bf16.shape == (B, g_output_dim)
    assert jnp.allclose(out_bf16, ref, atol=5e-2, rtol=5e-2)

    print("KERNEL_OK")
</pallas_src>

<mosaic_0001>
module attributes {stable_mosaic.version = 11 : i64} {
  func.func @_generator_kernel(%arg0: i32, %arg1: memref<8x16xf32, #tpu.memory_space<vmem>>, %arg2: memref<16x128xf32, #tpu.memory_space<vmem>>, %arg3: memref<1x128xf32, #tpu.memory_space<vmem>>, %arg4: memref<128x128xf32, #tpu.memory_space<vmem>>, %arg5: memref<1x128xf32, #tpu.memory_space<vmem>>, %arg6: memref<128x32xf32, #tpu.memory_space<vmem>>, %arg7: memref<1x32xf32, #tpu.memory_space<vmem>>, %arg8: memref<8x32xf32, #tpu.memory_space<vmem>>) attributes {dimension_semantics = [#tpu.dimension_semantics<parallel>], iteration_bounds = array<i64: 1>, scalar_prefetch = 0 : i64, scratch_operands = 0 : i64, tpu.core_type = #tpu.core_type<tc>, window_params = [{transform_indices = @transform_0, window_bounds = array<i64: 8, 16>}, {pipeline_mode = #tpu.pipeline_mode<synchronous>, transform_indices = @transform_1, window_bounds = array<i64: 16, 128>}, {pipeline_mode = #tpu.pipeline_mode<synchronous>, transform_indices = @transform_2, window_bounds = array<i64: 1, 128>}, {pipeline_mode = #tpu.pipeline_mode<synchronous>, transform_indices = @transform_3, window_bounds = array<i64: 128, 128>}, {pipeline_mode = #tpu.pipeline_mode<synchronous>, transform_indices = @transform_4, window_bounds = array<i64: 1, 128>}, {pipeline_mode = #tpu.pipeline_mode<synchronous>, transform_indices = @transform_5, window_bounds = array<i64: 128, 32>}, {pipeline_mode = #tpu.pipeline_mode<synchronous>, transform_indices = @transform_6, window_bounds = array<i64: 1, 32>}, {transform_indices = @transform_7, window_bounds = array<i64: 8, 32>}]} {
    %c0 = arith.constant 0 : index
    %c0_0 = arith.constant 0 : index
    %0 = vector.load %arg1[%c0, %c0_0] : memref<8x16xf32, #tpu.memory_space<vmem>>, vector<8x16xf32>
    %c0_1 = arith.constant 0 : index
    %c0_2 = arith.constant 0 : index
    %1 = vector.load %arg2[%c0_1, %c0_2] : memref<16x128xf32, #tpu.memory_space<vmem>>, vector<16x128xf32>
    %cst = arith.constant dense<0.000000e+00> : vector<8x128xf32>
    %2 = tpu.matmul %0, %1, %cst {dimension_numbers = #tpu.dot_dimension_numbers<[1], [0], [0], [1], [0, 0, 1, 1], [], []>} : vector<8x16xf32>, vector<16x128xf32>, vector<8x128xf32> -> vector<8x128xf32>
    %c0_3 = arith.constant 0 : index
    %c0_4 = arith.constant 0 : index
    %3 = vector.load %arg3[%c0_3, %c0_4] : memref<1x128xf32, #tpu.memory_space<vmem>>, vector<1x128xf32>
    %4 = vector.broadcast %3 : vector<1x128xf32> to vector<8x128xf32>
    %5 = arith.addf %2, %4 : vector<8x128xf32>
    %6 = math.tanh %5 : vector<8x128xf32>
    %c0_5 = arith.constant 0 : index
    %c0_6 = arith.constant 0 : index
    %7 = vector.load %arg4[%c0_5, %c0_6] : memref<128x128xf32, #tpu.memory_space<vmem>>, vector<128x128xf32>
    %cst_7 = arith.constant dense<0.000000e+00> : vector<8x128xf32>
    %8 = tpu.matmul %6, %7, %cst_7 {dimension_numbers = #tpu.dot_dimension_numbers<[1], [0], [0], [1], [0, 0, 1, 1], [], []>} : vector<8x128xf32>, vector<128x128xf32>, vector<8x128xf32> -> vector<8x128xf32>
    %c0_8 = arith.constant 0 : index
    %c0_9 = arith.constant 0 : index
    %9 = vector.load %arg5[%c0_8, %c0_9] : memref<1x128xf32, #tpu.memory_space<vmem>>, vector<1x128xf32>
    %10 = vector.broadcast %9 : vector<1x128xf32> to vector<8x128xf32>
    %11 = arith.addf %8, %10 : vector<8x128xf32>
    %12 = math.tanh %11 : vector<8x128xf32>
    %c0_10 = arith.constant 0 : index
    %c0_11 = arith.constant 0 : index
    %13 = vector.load %arg6[%c0_10, %c0_11] : memref<128x32xf32, #tpu.memory_space<vmem>>, vector<128x32xf32>
    %cst_12 = arith.constant dense<0.000000e+00> : vector<8x32xf32>
    %14 = tpu.matmul %12, %13, %cst_12 {dimension_numbers = #tpu.dot_dimension_numbers<[1], [0], [0], [1], [0, 0, 1, 1], [], []>} : vector<8x128xf32>, vector<128x32xf32>, vector<8x32xf32> -> vector<8x32xf32>
    %c0_13 = arith.constant 0 : index
    %c0_14 = arith.constant 0 : index
    %15 = vector.load %arg7[%c0_13, %c0_14] : memref<1x32xf32, #tpu.memory_space<vmem>>, vector<1x32xf32>
    %16 = vector.broadcast %15 : vector<1x32xf32> to vector<8x32xf32>
    %17 = arith.addf %14, %16 : vector<8x32xf32>
    %c0_15 = arith.constant 0 : index
    %c0_16 = arith.constant 0 : index
    %18 = vector.load %arg8[%c0_15, %c0_16] : memref<8x32xf32, #tpu.memory_space<vmem>>, vector<8x32xf32>
    tpu.vector_store %arg8[%c0_15, %c0_16], %17 {strides = array<i32>} : memref<8x32xf32, #tpu.memory_space<vmem>>, vector<8x32xf32>,
    return
  }
  func.func @transform_0(%arg0: i32) -> (i32, i32) {
    %c0_i32 = arith.constant 0 : i32
    %c0_i32_0 = arith.constant 0 : i32
    return %arg0, %c0_i32 : i32, i32
  }
  func.func @transform_1(%arg0: i32) -> (i32, i32) {
    %c0_i32 = arith.constant 0 : i32
    %c0_i32_0 = arith.constant 0 : i32
    %c0_i32_1 = arith.constant 0 : i32
    return %c0_i32, %c0_i32_0 : i32, i32
  }
  func.func @transform_2(%arg0: i32) -> (i32, i32) {
    %c0_i32 = arith.constant 0 : i32
    %c0_i32_0 = arith.constant 0 : i32
    %c0_i32_1 = arith.constant 0 : i32
    return %c0_i32, %c0_i32_0 : i32, i32
  }
  func.func @transform_3(%arg0: i32) -> (i32, i32) {
    %c0_i32 = arith.constant 0 : i32
    %c0_i32_0 = arith.constant 0 : i32
    %c0_i32_1 = arith.constant 0 : i32
    return %c0_i32, %c0_i32_0 : i32, i32
  }
  func.func @transform_4(%arg0: i32) -> (i32, i32) {
    %c0_i32 = arith.constant 0 : i32
    %c0_i32_0 = arith.constant 0 : i32
    %c0_i32_1 = arith.constant 0 : i32
    return %c0_i32, %c0_i32_0 : i32, i32
  }
  func.func @transform_5(%arg0: i32) -> (i32, i32) {
    %c0_i32 = arith.constant 0 : i32
    %c0_i32_0 = arith.constant 0 : i32
    %c0_i32_1 = arith.constant 0 : i32
    return %c0_i32, %c0_i32_0 : i32, i32
  }
  func.func @transform_6(%arg0: i32) -> (i32, i32) {
    %c0_i32 = arith.constant 0 : i32
    %c0_i32_0 = arith.constant 0 : i32
    %c0_i32_1 = arith.constant 0 : i32
    return %c0_i32, %c0_i32_0 : i32, i32
  }
  func.func @transform_7(%arg0: i32) -> (i32, i32) {
    %c0_i32 = arith.constant 0 : i32
    %c0_i32_0 = arith.constant 0 : i32
    return %arg0, %c0_i32 : i32, i32
  }
}

</mosaic_0001>

<bundles_post_ra>
// kernel: tpu_custom_call.1
= control target key start
LH: loop header
LB: loop body
LE: loop exit
PB: predicated region body
PF: predicated region fallthrough
CT: control target
= control target key end

     0   :  { %vm34_vm0 = vcmask 130048   ;;  %s351_s0 = inlined_call_operand.vmem [shape: f32[8,16], index: 0, kind: input, shape index: {}]   ;;  %s352_s1 = inlined_call_operand.vmem [shape: f32[16,128], index: 1, kind: input, shape index: {}]   ;;  %s353_s2 = inlined_call_operand.vmem [shape: f32[1,128], index: 2, kind: input, shape index: {}]   ;;  %s354_s3 = inlined_call_operand.vmem [shape: f32[128,128], index: 3, kind: input, shape index: {}]   ;;  %s355_s4 = inlined_call_operand.vmem [shape: f32[1,128], index: 4, kind: input, shape index: {}]   ;;  %s356_s5 = inlined_call_operand.vmem [shape: f32[128,32], index: 5, kind: input, shape index: {}]   ;;  %s357_s6 = inlined_call_operand.vmem [shape: f32[1,32], index: 6, kind: input, shape index: {}]   ;;  %s358_s7 = inlined_call_operand.hbm [shape: f32[8,32], index: 7, kind: output, shape index: {}]  }
   0x1   :  { %v29_v0 = vld [vmem:[%s352_s1 + $0x8] sm:$0xff]  ;;  %v28_v1 = vld [vmem:[%s352_s1] sm:$0xff]  ;;  %v74_v3 = vld [vmem:[%s354_s3 + $0x78] sm:$0xff] }
   0x2   :  { %52 = vmatpush.msra.mxu0 %v29_v0  ;;  %v27_v2 = vld [vmem:[%s351_s0] sm:$0xff]  ;;  %v73_v4 = vld [vmem:[%s354_s3 + $0x70] sm:$0xff]  ;;  %79 = vmatpush.msra.mxu1 %v74_v3  ;;  %v72_v5 = vld [vmem:[%s354_s3 + $0x68] sm:$0xff] }
   0x3   :  { %v71_v6 = vld [vmem:[%s354_s3 + $0x60] sm:$0xff] }
   0x4   :  { %53 = vmatpush.msra.mxu0 %v28_v1  ;;  %80 = vmatpush.msra.mxu1 %v73_v4 }
   0x5   :  { %158 = vmatmul.msk.f32.vlgmr.msra.gmra.mxu0 %vm34_vm0, %v27_v2 }
   0x6   :  { %81 = vmatpush.msra.mxu1 %v72_v5 }
   0x7   :  { %12 = vsyncpa [#allocation3], 0  ;;  %v70_v7 = vld [vmem:[%s354_s3 + $0x58] sm:$0xff]  ;;  %v69_v8 = vld [vmem:[%s354_s3 + $0x50] sm:$0xff]  ;;  %s193_s22 = smov [#allocation2]   ;;  %vm140_vm1 = vcmask 261120  }
   0x8   :  { %82 = vmatpush.msra.mxu1 %v71_v6  ;;  %v68_v9 = vld [vmem:[%s354_s3 + $0x48] sm:$0xff]  ;;  %v67_v10 = vld [vmem:[%s354_s3 + $0x40] sm:$0xff]  ;;  %v66_v11 = vld [vmem:[%s354_s3 + $0x38] sm:$0xff]  ;;  %s147_s23 = sshll.u32 %s193_s22, 4  ;;  %s148_s23 = int_to_ptr.vmem [resolvable:$true] %s147_s23 }
   0x9   :  { %v65_v12 = vld [vmem:[%s354_s3 + $0x30] sm:$0xff]  ;;  %v64_v13 = vld [vmem:[%s354_s3 + $0x28] sm:$0xff]  ;;  %v63_v14 = vld [vmem:[%s354_s3 + $0x20] sm:$0xff] }
   0xa   :  { %83 = vmatpush.msra.mxu1 %v70_v7  ;;  %v62_v15 = vld [vmem:[%s354_s3 + $0x18] sm:$0xff]  ;;  %v61_v16 = vld [vmem:[%s354_s3 + $0x10] sm:$0xff]  ;;  %v60_v17 = vld [vmem:[%s354_s3 + $0x8] sm:$0xff] }
   0xb   :  { %v59_v18 = vld [vmem:[%s354_s3] sm:$0xff]  ;;  %v115_v19 = vld [vmem:[%s356_s5 + $0x78] sm:$0xff]  ;;  %v114_v20 = vld [vmem:[%s356_s5 + $0x70] sm:$0xff] }
   0xc   :  { %84 = vmatpush.msra.mxu1 %v69_v8  ;;  %120 = vmatpush.msra.mxu2 %v115_v19  ;;  %v113_v21 = vld [vmem:[%s356_s5 + $0x68] sm:$0xff]  ;;  %v112_v22 = vld [vmem:[%s356_s5 + $0x60] sm:$0xff]  ;;  %v111_v23 = vld [vmem:[%s356_s5 + $0x58] sm:$0xff] }
   0xd   :  { %v110_v24 = vld [vmem:[%s356_s5 + $0x50] sm:$0xff]  ;;  %v109_v25 = vld [vmem:[%s356_s5 + $0x48] sm:$0xff]  ;;  %v108_v26 = vld [vmem:[%s356_s5 + $0x40] sm:$0xff] }
   0xe   :  { %85 = vmatpush.msra.mxu1 %v68_v9  ;;  %121 = vmatpush.msra.mxu2 %v114_v20  ;;  %v107_v27 = vld [vmem:[%s356_s5 + $0x38] sm:$0xff]  ;;  %v106_v28 = vld [vmem:[%s356_s5 + $0x30] sm:$0xff]  ;;  %v105_v29 = vld [vmem:[%s356_s5 + $0x28] sm:$0xff] }
   0xf   :  { %v160_v30 = vld [vmem:[%s353_s2] ss:$0 sm:$0xff]  ;;  %v103_v35 = vld [vmem:[%s356_s5 + $0x18] sm:$0xff]  ;;  %v102_v36 = vld [vmem:[%s356_s5 + $0x10] sm:$0xff] }
  0x10   :  { %86 = vmatpush.msra.mxu1 %v67_v10  ;;  %122 = vmatpush.msra.mxu2 %v113_v21  ;;  %v104_v34 = vld [vmem:[%s356_s5 + $0x20] sm:$0xff]  ;;  %v101_v37 = vld [vmem:[%s356_s5 + $0x8] sm:$0xff] }
  0x11   :  { %v100_v38 = vld [vmem:[%s356_s5] sm:$0xff]  ;;  %s149_s5 = sshll.u32 %s358_s7, 4  ;;  %s150_s5 = int_to_ptr.hbm [resolvable:$true] %s149_s5 }
  0x12   :  { %87 = vmatpush.msra.mxu1 %v66_v11  ;;  %123 = vmatpush.msra.mxu2 %v112_v22  ;;  %v161_v39 = vld [vmem:[%s355_s4] ss:$0 sm:$0xff] }
  0x13   :  { %v162_v43 = vld [vmem:[%s357_s6] ss:$0 sm:$0xff] }
  0x14   :  { %88 = vmatpush.msra.mxu1 %v65_v12  ;;  %124 = vmatpush.msra.mxu2 %v111_v23 }
  0x16   :  { %89 = vmatpush.msra.mxu1 %v64_v13  ;;  %125 = vmatpush.msra.mxu2 %v110_v24 }
  0x18   :  { %90 = vmatpush.msra.mxu1 %v63_v14  ;;  %126 = vmatpush.msra.mxu2 %v109_v25 }
  0x1a   :  { %91 = vmatpush.msra.mxu1 %v62_v15  ;;  %127 = vmatpush.msra.mxu2 %v108_v26 }
  0x1c   :  { %92 = vmatpush.msra.mxu1 %v61_v16  ;;  %128 = vmatpush.msra.mxu2 %v107_v27 }
  0x1e   :  { %93 = vmatpush.msra.mxu1 %v60_v17  ;;  %129 = vmatpush.msra.mxu2 %v106_v28 }
  0x20   :  { %94 = vmatpush.msra.mxu1 %v59_v18  ;;  %130 = vmatpush.msra.mxu2 %v105_v29 }
  0x22   :  { %131 = vmatpush.msra.mxu2 %v104_v34 }
  0x24   :  { %132 = vmatpush.msra.mxu2 %v103_v35 }
  0x26   :  { %133 = vmatpush.msra.mxu2 %v102_v36 }
  0x28   :  { %134 = vmatpush.msra.mxu2 %v101_v37 }
  0x2a   :  { %135 = vmatpush.msra.mxu2 %v100_v38 }
  0x82   :  { %v55_v31 = vpop.f32.mrf.mxu0 }
  0x83   :  { %v56_v32 = vadd.f32 %v160_v30, %v55_v31 }
  0x85   :  { %163 = vtanh.f32 %v56_v32 }
  0x8b   :  { %v164_v33 = vpop.eup %163 }
  0x8c   :  { %95 = vmatmul.f32.vlgmr.msra.gmra.mxu1 %v164_v33 }
 0x109   :  { %v96_v40 = vpop.f32.mrf.mxu1 }
 0x10a   :  { %v97_v41 = vadd.f32 %v161_v39, %v96_v40 }
 0x10c   :  { %165 = vtanh.f32 %v97_v41 }
 0x112   :  { %v166_v42 = vpop.eup %165 }
 0x113   :  { %136 = vmatmul.f32.vlgmr.msra.gmra.mxu2 %v166_v42 }
 0x196   :  { %v137_v44 = vpop.f32.mrf.mxu2 }
 0x197   :  { %v138_v45 = vadd.f32 %v162_v43, %v137_v44 }
 0x199   :  { %141 = vst.msk [vmem:[#allocation2] sm:$0xff] %vm140_vm1, %v138_v45 }
 0x19a   :  { %152 = dma.vmem_to_hbm [thread:$0]  %s148_s23, 128, %s150_s5, [#allocation3]  }
 0x19b   :  { %191 = dma.done.wait [#allocation3], 128  }
 0x19c   :  { %192 = vsyncadd [#allocation3], 4294967168 }
 0x19d   :  { %157 = vsyncpa [#allocation3], 1 }

</bundles_post_ra>
